<compile_context>
chip_gen: v5e
topology: v5e:2x2
jax: 0.10.0
libtpu: 0.0.40
codegen_flags: <defaults>
</compile_context>

<pallas_src>
import functools

import jax
import jax.numpy as jnp
from jax import lax
from jax.experimental import pallas as pl
from jax.experimental.pallas import tpu as pltpu


def _pair(v):
    return (v, v) if isinstance(v, int) else tuple(v)


def _quadruple(v):
    return (v, v, v, v) if isinstance(v, int) else tuple(v)


def _cas(a, b):
    """Compare-exchange: (min, max). Unused halves are DCE'd."""
    return jnp.minimum(a, b), jnp.maximum(a, b)


def _med3(a, b, c):
    """Median of three (4 min/max ops)."""
    mn = jnp.minimum(a, b)
    mx = jnp.maximum(a, b)
    return jnp.maximum(mn, jnp.minimum(mx, c))


def _sort3(a, b, c):
    """Elementwise sort of three arrays -> (lo, mid, hi), 6 min/max ops."""
    mn = jnp.minimum(a, b)
    mx = jnp.maximum(a, b)
    lo = jnp.minimum(mn, c)
    hi = jnp.maximum(mx, c)
    mid = jnp.maximum(mn, jnp.minimum(mx, c))
    return lo, mid, hi


def _lower_median_generic(vals):
    """Fallback for non-3x3 kernels: bubble network, torch lower-median.

    Only vals[(kk-1)//2] is consumed, so passes that cannot influence it are
    dead code and get pruned by the compiler.
    """
    kk = len(vals)
    p = list(vals)
    for i in range(kk):
        for j in range(kk - 1 - i):
            p[j], p[j + 1] = _cas(p[j], p[j + 1])
    return p[(kk - 1) // 2]


def _median_pool_kernel(x_ref, o_ref, *, kh, kw, sh, th, w_out, w_chunk):
    """One (H-tile, 128-lane block) per grid step.

    x_ref block: (th_in, w_in, 128)  halo'd input tile (lanes = W-tiles x NC)
    o_ref block: (th,    w_out, 128) strided-rows / dense-columns output

    Window shifts: di -> leading-dim offset (free), dj -> sublane offset.
    Stores are always full 128-lane (unmasked vst).
    """
    fast3x3 = (kh == 3 and kw == 3)
    # Static W chunks bound vreg pressure.
    w_chunks = [(w0, min(w_chunk, w_out - w0)) for w0 in range(0, w_out, w_chunk)]

    def row_body(r, carry):
        ri = r * sh
        for w0, wc in w_chunks:
            if fast3x3:
                # Shared vertical sorts: 3 strip loads + 6 ops shared by all
                # 3 horizontal positions, then ~12 merge ops per output.
                s0 = x_ref[ri + 0, pl.ds(w0, wc + 2), :]
                s1 = x_ref[ri + 1, pl.ds(w0, wc + 2), :]
                s2 = x_ref[ri + 2, pl.ds(w0, wc + 2), :]
                lo, mid, hi = _sort3(s0, s1, s2)
                x_lo = jnp.maximum(jnp.maximum(lo[0:wc], lo[1:wc + 1]), lo[2:wc + 2])
                z_hi = jnp.minimum(jnp.minimum(hi[0:wc], hi[1:wc + 1]), hi[2:wc + 2])
                y_mid = _med3(mid[0:wc], mid[1:wc + 1], mid[2:wc + 2])
                med = _med3(x_lo, y_mid, z_hi)   # median-of-9 identity
            else:
                vals = [x_ref[ri + di, pl.ds(w0 + dj, wc), :]
                        for di in range(kh) for dj in range(kw)]
                med = _lower_median_generic(vals)
            o_ref[r, pl.ds(w0, wc), :] = med.astype(o_ref.dtype)
        return carry

    unroll = True if th <= 16 else 8
    lax.fori_loop(0, th, row_body, 0, unroll=unroll)


def _reflect_index(q, n):
    """Reflect (no edge repeat) index map, valid for q in [-(n-1), 2n-2]."""
    return (n - 1) - jnp.abs((n - 1) - jnp.abs(q))


def _pick_vmem_limit_bytes():
    cap = None
    try:
        cap = pltpu.get_tpu_info().vmem_capacity_bytes
    except Exception:
        cap = None
    if not cap:
        cap = 64 * 1024 * 1024
    # ~48 MiB on v7x (64 MiB physical), 96 MiB on v5e/v6e (128 MiB physical).
    return int(min(cap * 3 // 4, 96 * 1024 * 1024))


def median_pool2d(x, kernel_size=3, stride=1, padding=0, same=False):
    """Equivalent of MedianPool2d.forward for NCHW input `x`."""
    kh, kw = _pair(kernel_size)
    sh, sw = _pair(stride)
    n, c, ih, iw = x.shape

    if same:
        ph = max(kh - sh, 0) if ih % sh == 0 else max(kh - ih % sh, 0)
        pw = max(kw - sw, 0) if iw % sw == 0 else max(kw - iw % sw, 0)
        pad_l, pad_r = pw // 2, pw - pw // 2
        pad_t, pad_b = ph // 2, ph - ph // 2
    else:
        pad_l, pad_r, pad_t, pad_b = _quadruple(padding)

    h_pad = ih + pad_t + pad_b
    w_pad = iw + pad_l + pad_r
    h_out = (h_pad - kh) // sh + 1      # strided rows: computed in-kernel
    w_dense = w_pad - kw + 1            # dense columns: computed in-kernel
    w_out = (w_pad - kw) // sw + 1
    nc = n * c
    lanes = 128
    itemsize = jnp.dtype(x.dtype).itemsize

    # ---- lane packing: lane = w_tile * nc + channel (fills lanes for nc<128)
    if nc >= lanes:
        n_wt = 1
    else:
        n_wt = max(1, min(lanes // nc, -(-w_dense // min(8, w_dense))))
    wt_width = -(-w_dense // n_wt)          # dense output cols per W lane-tile
    wt_s = wt_width + kw - 1                # input cols per W lane-tile (halo)
    lanes_used = n_wt * nc
    ncp = -(-lanes_used // lanes) * lanes
    nc_blocks = ncp // lanes

    # ---- H tiling: halo'd row tiles sized ~<=2 MiB, >=2 tiles for megacore
    in_row_bytes = wt_s * lanes * itemsize
    th = max(1, min(h_out, (2 * 1024 * 1024) // max(1, sh * in_row_bytes), 64))
    if nc_blocks == 1 and h_out >= 2:
        th = min(th, -(-h_out // 2))
    h_tiles = -(-h_out // th)
    th_in = (th - 1) * sh + kh

    # ---- one wrapper gather builds reflect-padded, halo'd, lane-packed tiles
    x_t = jnp.transpose(x, (2, 3, 0, 1)).reshape(ih, iw, nc)

    rows_p = jnp.arange(h_tiles)[:, None] * (th * sh) + jnp.arange(th_in)[None, :]
    rows_p = jnp.minimum(rows_p, h_pad - 1)                 # overshoot rows -> garbage, sliced later
    rows_src = _reflect_index(rows_p - pad_t, ih)

    cols_p = jnp.arange(wt_s)[:, None] + jnp.arange(n_wt)[None, :] * wt_width
    cols_p = jnp.minimum(cols_p, w_pad - 1)
    cols_src = _reflect_index(cols_p - pad_l, iw)

    x_tiles = x_t[rows_src[:, :, None, None], cols_src[None, None, :, :], :]
    x_tiles = x_tiles.reshape(h_tiles * th_in, wt_s, lanes_used)
    if ncp != lanes_used:
        x_tiles = jnp.pad(x_tiles, ((0, 0), (0, 0), (0, ncp - lanes_used)))

    fast3x3 = (kh == 3 and kw == 3)
    if fast3x3:
        w_chunk = 32 if itemsize <= 2 else 16   # keep strips + slices in vregs
    else:
        w_chunk = 8

    kernel = functools.partial(
        _median_pool_kernel,
        kh=kh, kw=kw, sh=sh, th=th, w_out=wt_width, w_chunk=w_chunk,
    )

    out_tiles = pl.pallas_call(
        kernel,
        out_shape=jax.ShapeDtypeStruct((h_tiles * th, wt_width, ncp), x.dtype),
        grid=(h_tiles, nc_blocks),
        in_specs=[pl.BlockSpec((th_in, wt_s, lanes), lambda h, b: (h, 0, b))],
        out_specs=pl.BlockSpec((th, wt_width, lanes), lambda h, b: (h, 0, b)),
        compiler_params=pltpu.CompilerParams(
            dimension_semantics=("parallel", "parallel"),
            vmem_limit_bytes=_pick_vmem_limit_bytes(),
        ),
    )(x_tiles)

    # ---- unpack: (rows, wt_width, n_wt*nc) -> (n, c, h_out, w_out)
    out = out_tiles[:h_out, :, :lanes_used]
    out = out.reshape(h_out, wt_width, n_wt, nc)
    out = jnp.transpose(out, (3, 0, 2, 1)).reshape(nc, h_out, n_wt * wt_width)
    out = out[:, :, :w_dense]
    if sw != 1:
        out = out[:, :, ::sw]
    return out.reshape(n, c, h_out, w_out)


def _median_pool2d_ref(x, kernel_size=3, stride=1, padding=0, same=False):
    """Pure-JAX reference mirroring the PyTorch forward (for sanity checking)."""
    kh, kw = _pair(kernel_size)
    sh, sw = _pair(stride)
    n, c, ih, iw = x.shape
    if same:
        ph = max(kh - sh, 0) if ih % sh == 0 else max(kh - ih % sh, 0)
        pw = max(kw - sw, 0) if iw % sw == 0 else max(kw - iw % sw, 0)
        pad_l, pad_r = pw // 2, pw - pw // 2
        pad_t, pad_b = ph // 2, ph - ph // 2
    else:
        pad_l, pad_r, pad_t, pad_b = _quadruple(padding)
    xpad = jnp.pad(x, ((0, 0), (0, 0), (pad_t, pad_b), (pad_l, pad_r)), mode="reflect")
    hp, wp = xpad.shape[2], xpad.shape[3]
    h_out = (hp - kh) // sh + 1
    w_out = (wp - kw) // sw + 1
    windows = []
    for di in range(kh):
        for dj in range(kw):
            windows.append(
                xpad[:, :, di:di + (h_out - 1) * sh + 1:sh,
                          dj:dj + (w_out - 1) * sw + 1:sw]
            )
    stacked = jnp.stack(windows, axis=-1)
    srt = jnp.sort(stacked, axis=-1)
    return srt[..., (kh * kw - 1) // 2]


if __name__ == "__main__":
    key = jax.random.PRNGKey(0)
    x = jax.random.normal(key, (2, 4, 16, 16), dtype=jnp.float32)

    # 1) Default module config: kernel_size=3, stride=1, padding=0, same=False.
    out_default = median_pool2d(x, kernel_size=3, stride=1, padding=0, same=False)
    jax.block_until_ready(out_default)
    ref_default = _median_pool2d_ref(x, kernel_size=3, stride=1, padding=0, same=False)
    assert out_default.shape == (2, 4, 14, 14)
    assert jnp.allclose(out_default, ref_default)

    # 2) "same" padding path (reflect padding exercised).
    out_same = median_pool2d(x, kernel_size=3, stride=1, same=True)
    jax.block_until_ready(out_same)
    ref_same = _median_pool2d_ref(x, kernel_size=3, stride=1, same=True)
    assert out_same.shape == (2, 4, 16, 16)
    assert jnp.allclose(out_same, ref_same)

    # 3) Strided pooling: rows strided in-kernel, columns subsampled in wrapper.
    out_s2 = median_pool2d(x, kernel_size=3, stride=2, same=True)
    jax.block_until_ready(out_s2)
    ref_s2 = _median_pool2d_ref(x, kernel_size=3, stride=2, same=True)
    assert out_s2.shape == (2, 4, 8, 8)
    assert jnp.allclose(out_s2, ref_s2)

    # 4) Non-3x3 kernel exercises the generic lower-median fallback network.
    out_k5 = median_pool2d(x, kernel_size=5, stride=1, same=True)
    jax.block_until_ready(out_k5)
    ref_k5 = _median_pool2d_ref(x, kernel_size=5, stride=1, same=True)
    assert out_k5.shape == (2, 4, 16, 16)
    assert jnp.allclose(out_k5, ref_k5)

    print("KERNEL_OK")
</pallas_src>

<mosaic_0001>
module attributes {stable_mosaic.version = 11 : i64} {
  func.func @_median_pool_kernel(%arg0: i32, %arg1: i32, %arg2: memref<9x9x128xf32, #tpu.memory_space<vmem>>, %arg3: memref<7x7x128xf32, #tpu.memory_space<vmem>>) attributes {dimension_semantics = [#tpu.dimension_semantics<parallel>, #tpu.dimension_semantics<parallel>], iteration_bounds = array<i64: 2, 1>, scalar_prefetch = 0 : i64, scratch_operands = 0 : i64, tpu.core_type = #tpu.core_type<tc>, window_params = [{transform_indices = @transform_0, window_bounds = array<i64: 9, 9, 128>}, {transform_indices = @transform_1, window_bounds = array<i64: 7, 7, 128>}]} {
    %c0_i32 = arith.constant 0 : i32
    %c1_i32 = arith.constant 1 : i32
    %0 = arith.muli %c0_i32, %c1_i32 : i32
    %c0_i32_0 = arith.constant 0 : i32
    %1 = arith.addi %0, %c0_i32_0 : i32
    %2 = arith.index_cast %1 : i32 to index
    %c0 = arith.constant 0 : index
    %c0_1 = arith.constant 0 : index
    %3 = vector.load %arg2[%2, %c0, %c0_1] : memref<9x9x128xf32, #tpu.memory_space<vmem>>, vector<1x9x128xf32>
    %4 = vector.shape_cast %3 : vector<1x9x128xf32> to vector<9x128xf32>
    %c1_i32_2 = arith.constant 1 : i32
    %5 = arith.addi %0, %c1_i32_2 : i32
    %6 = arith.index_cast %5 : i32 to index
    %c0_3 = arith.constant 0 : index
    %c0_4 = arith.constant 0 : index
    %7 = vector.load %arg2[%6, %c0_3, %c0_4] : memref<9x9x128xf32, #tpu.memory_space<vmem>>, vector<1x9x128xf32>
    %8 = vector.shape_cast %7 : vector<1x9x128xf32> to vector<9x128xf32>
    %c2_i32 = arith.constant 2 : i32
    %9 = arith.addi %0, %c2_i32 : i32
    %10 = arith.index_cast %9 : i32 to index
    %c0_5 = arith.constant 0 : index
    %c0_6 = arith.constant 0 : index
    %11 = vector.load %arg2[%10, %c0_5, %c0_6] : memref<9x9x128xf32, #tpu.memory_space<vmem>>, vector<1x9x128xf32>
    %12 = vector.shape_cast %11 : vector<1x9x128xf32> to vector<9x128xf32>
    %13 = arith.minimumf %4, %8 : vector<9x128xf32>
    %14 = arith.maximumf %4, %8 : vector<9x128xf32>
    %15 = arith.minimumf %13, %12 : vector<9x128xf32>
    %16 = arith.maximumf %14, %12 : vector<9x128xf32>
    %17 = arith.minimumf %14, %12 : vector<9x128xf32>
    %18 = arith.maximumf %13, %17 : vector<9x128xf32>
    %19 = vector.extract_strided_slice %15 {offsets = [0, 0], sizes = [7, 128], strides = [1, 1]} : vector<9x128xf32> to vector<7x128xf32>
    %20 = vector.extract_strided_slice %15 {offsets = [1, 0], sizes = [7, 128], strides = [1, 1]} : vector<9x128xf32> to vector<7x128xf32>
    %21 = arith.maximumf %19, %20 : vector<7x128xf32>
    %22 = vector.extract_strided_slice %15 {offsets = [2, 0], sizes = [7, 128], strides = [1, 1]} : vector<9x128xf32> to vector<7x128xf32>
    %23 = arith.maximumf %21, %22 : vector<7x128xf32>
    %24 = vector.extract_strided_slice %16 {offsets = [0, 0], sizes = [7, 128], strides = [1, 1]} : vector<9x128xf32> to vector<7x128xf32>
    %25 = vector.extract_strided_slice %16 {offsets = [1, 0], sizes = [7, 128], strides = [1, 1]} : vector<9x128xf32> to vector<7x128xf32>
    %26 = arith.minimumf %24, %25 : vector<7x128xf32>
    %27 = vector.extract_strided_slice %16 {offsets = [2, 0], sizes = [7, 128], strides = [1, 1]} : vector<9x128xf32> to vector<7x128xf32>
    %28 = arith.minimumf %26, %27 : vector<7x128xf32>
    %29 = vector.extract_strided_slice %18 {offsets = [0, 0], sizes = [7, 128], strides = [1, 1]} : vector<9x128xf32> to vector<7x128xf32>
    %30 = vector.extract_strided_slice %18 {offsets = [1, 0], sizes = [7, 128], strides = [1, 1]} : vector<9x128xf32> to vector<7x128xf32>
    %31 = vector.extract_strided_slice %18 {offsets = [2, 0], sizes = [7, 128], strides = [1, 1]} : vector<9x128xf32> to vector<7x128xf32>
    %32 = arith.minimumf %29, %30 : vector<7x128xf32>
    %33 = arith.maximumf %29, %30 : vector<7x128xf32>
    %34 = arith.minimumf %33, %31 : vector<7x128xf32>
    %35 = arith.maximumf %32, %34 : vector<7x128xf32>
    %36 = arith.minimumf %23, %35 : vector<7x128xf32>
    %37 = arith.maximumf %23, %35 : vector<7x128xf32>
    %38 = arith.minimumf %37, %28 : vector<7x128xf32>
    %39 = arith.maximumf %36, %38 : vector<7x128xf32>
    %40 = arith.index_cast %c0_i32 : i32 to index
    %c0_7 = arith.constant 0 : index
    %c0_8 = arith.constant 0 : index
    %41 = vector.load %arg3[%40, %c0_7, %c0_8] : memref<7x7x128xf32, #tpu.memory_space<vmem>>, vector<1x7x128xf32>
    %42 = vector.shape_cast %41 : vector<1x7x128xf32> to vector<7x128xf32>
    %43 = vector.shape_cast %39 : vector<7x128xf32> to vector<1x7x128xf32>
    tpu.vector_store %arg3[%40, %c0_7, %c0_8], %43 {strides = array<i32>} : memref<7x7x128xf32, #tpu.memory_space<vmem>>, vector<1x7x128xf32>,
    %c1_i32_9 = arith.constant 1 : i32
    %c1_i32_10 = arith.constant 1 : i32
    %44 = arith.muli %c1_i32_9, %c1_i32_10 : i32
    %c0_i32_11 = arith.constant 0 : i32
    %45 = arith.addi %44, %c0_i32_11 : i32
    %46 = arith.index_cast %45 : i32 to index
    %c0_12 = arith.constant 0 : index
    %c0_13 = arith.constant 0 : index
    %47 = vector.load %arg2[%46, %c0_12, %c0_13] : memref<9x9x128xf32, #tpu.memory_space<vmem>>, vector<1x9x128xf32>
    %48 = vector.shape_cast %47 : vector<1x9x128xf32> to vector<9x128xf32>
    %c1_i32_14 = arith.constant 1 : i32
    %49 = arith.addi %44, %c1_i32_14 : i32
    %50 = arith.index_cast %49 : i32 to index
    %c0_15 = arith.constant 0 : index
    %c0_16 = arith.constant 0 : index
    %51 = vector.load %arg2[%50, %c0_15, %c0_16] : memref<9x9x128xf32, #tpu.memory_space<vmem>>, vector<1x9x128xf32>
    %52 = vector.shape_cast %51 : vector<1x9x128xf32> to vector<9x128xf32>
    %c2_i32_17 = arith.constant 2 : i32
    %53 = arith.addi %44, %c2_i32_17 : i32
    %54 = arith.index_cast %53 : i32 to index
    %c0_18 = arith.constant 0 : index
    %c0_19 = arith.constant 0 : index
    %55 = vector.load %arg2[%54, %c0_18, %c0_19] : memref<9x9x128xf32, #tpu.memory_space<vmem>>, vector<1x9x128xf32>
    %56 = vector.shape_cast %55 : vector<1x9x128xf32> to vector<9x128xf32>
    %57 = arith.minimumf %48, %52 : vector<9x128xf32>
    %58 = arith.maximumf %48, %52 : vector<9x128xf32>
    %59 = arith.minimumf %57, %56 : vector<9x128xf32>
    %60 = arith.maximumf %58, %56 : vector<9x128xf32>
    %61 = arith.minimumf %58, %56 : vector<9x128xf32>
    %62 = arith.maximumf %57, %61 : vector<9x128xf32>
    %63 = vector.extract_strided_slice %59 {offsets = [0, 0], sizes = [7, 128], strides = [1, 1]} : vector<9x128xf32> to vector<7x128xf32>
    %64 = vector.extract_strided_slice %59 {offsets = [1, 0], sizes = [7, 128], strides = [1, 1]} : vector<9x128xf32> to vector<7x128xf32>
    %65 = arith.maximumf %63, %64 : vector<7x128xf32>
    %66 = vector.extract_strided_slice %59 {offsets = [2, 0], sizes = [7, 128], strides = [1, 1]} : vector<9x128xf32> to vector<7x128xf32>
    %67 = arith.maximumf %65, %66 : vector<7x128xf32>
    %68 = vector.extract_strided_slice %60 {offsets = [0, 0], sizes = [7, 128], strides = [1, 1]} : vector<9x128xf32> to vector<7x128xf32>
    %69 = vector.extract_strided_slice %60 {offsets = [1, 0], sizes = [7, 128], strides = [1, 1]} : vector<9x128xf32> to vector<7x128xf32>
    %70 = arith.minimumf %68, %69 : vector<7x128xf32>
    %71 = vector.extract_strided_slice %60 {offsets = [2, 0], sizes = [7, 128], strides = [1, 1]} : vector<9x128xf32> to vector<7x128xf32>
    %72 = arith.minimumf %70, %71 : vector<7x128xf32>
    %73 = vector.extract_strided_slice %62 {offsets = [0, 0], sizes = [7, 128], strides = [1, 1]} : vector<9x128xf32> to vector<7x128xf32>
    %74 = vector.extract_strided_slice %62 {offsets = [1, 0], sizes = [7, 128], strides = [1, 1]} : vector<9x128xf32> to vector<7x128xf32>
    %75 = vector.extract_strided_slice %62 {offsets = [2, 0], sizes = [7, 128], strides = [1, 1]} : vector<9x128xf32> to vector<7x128xf32>
    %76 = arith.minimumf %73, %74 : vector<7x128xf32>
    %77 = arith.maximumf %73, %74 : vector<7x128xf32>
    %78 = arith.minimumf %77, %75 : vector<7x128xf32>
    %79 = arith.maximumf %76, %78 : vector<7x128xf32>
    %80 = arith.minimumf %67, %79 : vector<7x128xf32>
    %81 = arith.maximumf %67, %79 : vector<7x128xf32>
    %82 = arith.minimumf %81, %72 : vector<7x128xf32>
    %83 = arith.maximumf %80, %82 : vector<7x128xf32>
    %84 = arith.index_cast %c1_i32_9 : i32 to index
    %c0_20 = arith.constant 0 : index
    %c0_21 = arith.constant 0 : index
    %85 = vector.load %arg3[%84, %c0_20, %c0_21] : memref<7x7x128xf32, #tpu.memory_space<vmem>>, vector<1x7x128xf32>
    %86 = vector.shape_cast %85 : vector<1x7x128xf32> to vector<7x128xf32>
    %87 = vector.shape_cast %83 : vector<7x128xf32> to vector<1x7x128xf32>
    tpu.vector_store %arg3[%84, %c0_20, %c0_21], %87 {strides = array<i32>} : memref<7x7x128xf32, #tpu.memory_space<vmem>>, vector<1x7x128xf32>,
    %c2_i32_22 = arith.constant 2 : i32
    %c1_i32_23 = arith.constant 1 : i32
    %88 = arith.muli %c2_i32_22, %c1_i32_23 : i32
    %c0_i32_24 = arith.constant 0 : i32
    %89 = arith.addi %88, %c0_i32_24 : i32
    %90 = arith.index_cast %89 : i32 to index
    %c0_25 = arith.constant 0 : index
    %c0_26 = arith.constant 0 : index
    %91 = vector.load %arg2[%90, %c0_25, %c0_26] : memref<9x9x128xf32, #tpu.memory_space<vmem>>, vector<1x9x128xf32>
    %92 = vector.shape_cast %91 : vector<1x9x128xf32> to vector<9x128xf32>
    %c1_i32_27 = arith.constant 1 : i32
    %93 = arith.addi %88, %c1_i32_27 : i32
    %94 = arith.index_cast %93 : i32 to index
    %c0_28 = arith.constant 0 : index
    %c0_29 = arith.constant 0 : index
    %95 = vector.load %arg2[%94, %c0_28, %c0_29] : memref<9x9x128xf32, #tpu.memory_space<vmem>>, vector<1x9x128xf32>
    %96 = vector.shape_cast %95 : vector<1x9x128xf32> to vector<9x128xf32>
    %c2_i32_30 = arith.constant 2 : i32
    %97 = arith.addi %88, %c2_i32_30 : i32
    %98 = arith.index_cast %97 : i32 to index
    %c0_31 = arith.constant 0 : index
    %c0_32 = arith.constant 0 : index
    %99 = vector.load %arg2[%98, %c0_31, %c0_32] : memref<9x9x128xf32, #tpu.memory_space<vmem>>, vector<1x9x128xf32>
    %100 = vector.shape_cast %99 : vector<1x9x128xf32> to vector<9x128xf32>
    %101 = arith.minimumf %92, %96 : vector<9x128xf32>
    %102 = arith.maximumf %92, %96 : vector<9x128xf32>
    %103 = arith.minimumf %101, %100 : vector<9x128xf32>
    %104 = arith.maximumf %102, %100 : vector<9x128xf32>
    %105 = arith.minimumf %102, %100 : vector<9x128xf32>
    %106 = arith.maximumf %101, %105 : vector<9x128xf32>
    %107 = vector.extract_strided_slice %103 {offsets = [0, 0], sizes = [7, 128], strides = [1, 1]} : vector<9x128xf32> to vector<7x128xf32>
    %108 = vector.extract_strided_slice %103 {offsets = [1, 0], sizes = [7, 128], strides = [1, 1]} : vector<9x128xf32> to vector<7x128xf32>
    %109 = arith.maximumf %107, %108 : vector<7x128xf32>
    %110 = vector.extract_strided_slice %103 {offsets = [2, 0], sizes = [7, 128], strides = [1, 1]} : vector<9x128xf32> to vector<7x128xf32>
    %111 = arith.maximumf %109, %110 : vector<7x128xf32>
    %112 = vector.extract_strided_slice %104 {offsets = [0, 0], sizes = [7, 128], strides = [1, 1]} : vector<9x128xf32> to vector<7x128xf32>
    %113 = vector.extract_strided_slice %104 {offsets = [1, 0], sizes = [7, 128], strides = [1, 1]} : vector<9x128xf32> to vector<7x128xf32>
    %114 = arith.minimumf %112, %113 : vector<7x128xf32>
    %115 = vector.extract_strided_slice %104 {offsets = [2, 0], sizes = [7, 128], strides = [1, 1]} : vector<9x128xf32> to vector<7x128xf32>
    %116 = arith.minimumf %114, %115 : vector<7x128xf32>
    %117 = vector.extract_strided_slice %106 {offsets = [0, 0], sizes = [7, 128], strides = [1, 1]} : vector<9x128xf32> to vector<7x128xf32>
    %118 = vector.extract_strided_slice %106 {offsets = [1, 0], sizes = [7, 128], strides = [1, 1]} : vector<9x128xf32> to vector<7x128xf32>
    %119 = vector.extract_strided_slice %106 {offsets = [2, 0], sizes = [7, 128], strides = [1, 1]} : vector<9x128xf32> to vector<7x128xf32>
    %120 = arith.minimumf %117, %118 : vector<7x128xf32>
    %121 = arith.maximumf %117, %118 : vector<7x128xf32>
    %122 = arith.minimumf %121, %119 : vector<7x128xf32>
    %123 = arith.maximumf %120, %122 : vector<7x128xf32>
    %124 = arith.minimumf %111, %123 : vector<7x128xf32>
    %125 = arith.maximumf %111, %123 : vector<7x128xf32>
    %126 = arith.minimumf %125, %116 : vector<7x128xf32>
    %127 = arith.maximumf %124, %126 : vector<7x128xf32>
    %128 = arith.index_cast %c2_i32_22 : i32 to index
    %c0_33 = arith.constant 0 : index
    %c0_34 = arith.constant 0 : index
    %129 = vector.load %arg3[%128, %c0_33, %c0_34] : memref<7x7x128xf32, #tpu.memory_space<vmem>>, vector<1x7x128xf32>
    %130 = vector.shape_cast %129 : vector<1x7x128xf32> to vector<7x128xf32>
    %131 = vector.shape_cast %127 : vector<7x128xf32> to vector<1x7x128xf32>
    tpu.vector_store %arg3[%128, %c0_33, %c0_34], %131 {strides = array<i32>} : memref<7x7x128xf32, #tpu.memory_space<vmem>>, vector<1x7x128xf32>,
    %c3_i32 = arith.constant 3 : i32
    %c1_i32_35 = arith.constant 1 : i32
    %132 = arith.muli %c3_i32, %c1_i32_35 : i32
    %c0_i32_36 = arith.constant 0 : i32
    %133 = arith.addi %132, %c0_i32_36 : i32
    %134 = arith.index_cast %133 : i32 to index
    %c0_37 = arith.constant 0 : index
    %c0_38 = arith.constant 0 : index
    %135 = vector.load %arg2[%134, %c0_37, %c0_38] : memref<9x9x128xf32, #tpu.memory_space<vmem>>, vector<1x9x128xf32>
    %136 = vector.shape_cast %135 : vector<1x9x128xf32> to vector<9x128xf32>
    %c1_i32_39 = arith.constant 1 : i32
    %137 = arith.addi %132, %c1_i32_39 : i32
    %138 = arith.index_cast %137 : i32 to index
    %c0_40 = arith.constant 0 : index
    %c0_41 = arith.constant 0 : index
    %139 = vector.load %arg2[%138, %c0_40, %c0_41] : memref<9x9x128xf32, #tpu.memory_space<vmem>>, vector<1x9x128xf32>
    %140 = vector.shape_cast %139 : vector<1x9x128xf32> to vector<9x128xf32>
    %c2_i32_42 = arith.constant 2 : i32
    %141 = arith.addi %132, %c2_i32_42 : i32
    %142 = arith.index_cast %141 : i32 to index
    %c0_43 = arith.constant 0 : index
    %c0_44 = arith.constant 0 : index
    %143 = vector.load %arg2[%142, %c0_43, %c0_44] : memref<9x9x128xf32, #tpu.memory_space<vmem>>, vector<1x9x128xf32>
    %144 = vector.shape_cast %143 : vector<1x9x128xf32> to vector<9x128xf32>
    %145 = arith.minimumf %136, %140 : vector<9x128xf32>
    %146 = arith.maximumf %136, %140 : vector<9x128xf32>
    %147 = arith.minimumf %145, %144 : vector<9x128xf32>
    %148 = arith.maximumf %146, %144 : vector<9x128xf32>
    %149 = arith.minimumf %146, %144 : vector<9x128xf32>
    %150 = arith.maximumf %145, %149 : vector<9x128xf32>
    %151 = vector.extract_strided_slice %147 {offsets = [0, 0], sizes = [7, 128], strides = [1, 1]} : vector<9x128xf32> to vector<7x128xf32>
    %152 = vector.extract_strided_slice %147 {offsets = [1, 0], sizes = [7, 128], strides = [1, 1]} : vector<9x128xf32> to vector<7x128xf32>
    %153 = arith.maximumf %151, %152 : vector<7x128xf32>
    %154 = vector.extract_strided_slice %147 {offsets = [2, 0], sizes = [7, 128], strides = [1, 1]} : vector<9x128xf32> to vector<7x128xf32>
    %155 = arith.maximumf %153, %154 : vector<7x128xf32>
    %156 = vector.extract_strided_slice %148 {offsets = [0, 0], sizes = [7, 128], strides = [1, 1]} : vector<9x128xf32> to vector<7x128xf32>
    %157 = vector.extract_strided_slice %148 {offsets = [1, 0], sizes = [7, 128], strides = [1, 1]} : vector<9x128xf32> to vector<7x128xf32>
    %158 = arith.minimumf %156, %157 : vector<7x128xf32>
    %159 = vector.extract_strided_slice %148 {offsets = [2, 0], sizes = [7, 128], strides = [1, 1]} : vector<9x128xf32> to vector<7x128xf32>
    %160 = arith.minimumf %158, %159 : vector<7x128xf32>
    %161 = vector.extract_strided_slice %150 {offsets = [0, 0], sizes = [7, 128], strides = [1, 1]} : vector<9x128xf32> to vector<7x128xf32>
    %162 = vector.extract_strided_slice %150 {offsets = [1, 0], sizes = [7, 128], strides = [1, 1]} : vector<9x128xf32> to vector<7x128xf32>
    %163 = vector.extract_strided_slice %150 {offsets = [2, 0], sizes = [7, 128], strides = [1, 1]} : vector<9x128xf32> to vector<7x128xf32>
    %164 = arith.minimumf %161, %162 : vector<7x128xf32>
    %165 = arith.maximumf %161, %162 : vector<7x128xf32>
    %166 = arith.minimumf %165, %163 : vector<7x128xf32>
    %167 = arith.maximumf %164, %166 : vector<7x128xf32>
    %168 = arith.minimumf %155, %167 : vector<7x128xf32>
    %169 = arith.maximumf %155, %167 : vector<7x128xf32>
    %170 = arith.minimumf %169, %160 : vector<7x128xf32>
    %171 = arith.maximumf %168, %170 : vector<7x128xf32>
    %172 = arith.index_cast %c3_i32 : i32 to index
    %c0_45 = arith.constant 0 : index
    %c0_46 = arith.constant 0 : index
    %173 = vector.load %arg3[%172, %c0_45, %c0_46] : memref<7x7x128xf32, #tpu.memory_space<vmem>>, vector<1x7x128xf32>
    %174 = vector.shape_cast %173 : vector<1x7x128xf32> to vector<7x128xf32>
    %175 = vector.shape_cast %171 : vector<7x128xf32> to vector<1x7x128xf32>
    tpu.vector_store %arg3[%172, %c0_45, %c0_46], %175 {strides = array<i32>} : memref<7x7x128xf32, #tpu.memory_space<vmem>>, vector<1x7x128xf32>,
    %c4_i32 = arith.constant 4 : i32
    %c1_i32_47 = arith.constant 1 : i32
    %176 = arith.muli %c4_i32, %c1_i32_47 : i32
    %c0_i32_48 = arith.constant 0 : i32
    %177 = arith.addi %176, %c0_i32_48 : i32
    %178 = arith.index_cast %177 : i32 to index
    %c0_49 = arith.constant 0 : index
    %c0_50 = arith.constant 0 : index
    %179 = vector.load %arg2[%178, %c0_49, %c0_50] : memref<9x9x128xf32, #tpu.memory_space<vmem>>, vector<1x9x128xf32>
    %180 = vector.shape_cast %179 : vector<1x9x128xf32> to vector<9x128xf32>
    %c1_i32_51 = arith.constant 1 : i32
    %181 = arith.addi %176, %c1_i32_51 : i32
    %182 = arith.index_cast %181 : i32 to index
    %c0_52 = arith.constant 0 : index
    %c0_53 = arith.constant 0 : index
    %183 = vector.load %arg2[%182, %c0_52, %c0_53] : memref<9x9x128xf32, #tpu.memory_space<vmem>>, vector<1x9x128xf32>
    %184 = vector.shape_cast %183 : vector<1x9x128xf32> to vector<9x128xf32>
    %c2_i32_54 = arith.constant 2 : i32
    %185 = arith.addi %176, %c2_i32_54 : i32
    %186 = arith.index_cast %185 : i32 to index
    %c0_55 = arith.constant 0 : index
    %c0_56 = arith.constant 0 : index
    %187 = vector.load %arg2[%186, %c0_55, %c0_56] : memref<9x9x128xf32, #tpu.memory_space<vmem>>, vector<1x9x128xf32>
    %188 = vector.shape_cast %187 : vector<1x9x128xf32> to vector<9x128xf32>
    %189 = arith.minimumf %180, %184 : vector<9x128xf32>
    %190 = arith.maximumf %180, %184 : vector<9x128xf32>
    %191 = arith.minimumf %189, %188 : vector<9x128xf32>
    %192 = arith.maximumf %190, %188 : vector<9x128xf32>
    %193 = arith.minimumf %190, %188 : vector<9x128xf32>
    %194 = arith.maximumf %189, %193 : vector<9x128xf32>
    %195 = vector.extract_strided_slice %191 {offsets = [0, 0], sizes = [7, 128], strides = [1, 1]} : vector<9x128xf32> to vector<7x128xf32>
    %196 = vector.extract_strided_slice %191 {offsets = [1, 0], sizes = [7, 128], strides = [1, 1]} : vector<9x128xf32> to vector<7x128xf32>
    %197 = arith.maximumf %195, %196 : vector<7x128xf32>
    %198 = vector.extract_strided_slice %191 {offsets = [2, 0], sizes = [7, 128], strides = [1, 1]} : vector<9x128xf32> to vector<7x128xf32>
    %199 = arith.maximumf %197, %198 : vector<7x128xf32>
    %200 = vector.extract_strided_slice %192 {offsets = [0, 0], sizes = [7, 128], strides = [1, 1]} : vector<9x128xf32> to vector<7x128xf32>
    %201 = vector.extract_strided_slice %192 {offsets = [1, 0], sizes = [7, 128], strides = [1, 1]} : vector<9x128xf32> to vector<7x128xf32>
    %202 = arith.minimumf %200, %201 : vector<7x128xf32>
    %203 = vector.extract_strided_slice %192 {offsets = [2, 0], sizes = [7, 128], strides = [1, 1]} : vector<9x128xf32> to vector<7x128xf32>
    %204 = arith.minimumf %202, %203 : vector<7x128xf32>
    %205 = vector.extract_strided_slice %194 {offsets = [0, 0], sizes = [7, 128], strides = [1, 1]} : vector<9x128xf32> to vector<7x128xf32>
    %206 = vector.extract_strided_slice %194 {offsets = [1, 0], sizes = [7, 128], strides = [1, 1]} : vector<9x128xf32> to vector<7x128xf32>
    %207 = vector.extract_strided_slice %194 {offsets = [2, 0], sizes = [7, 128], strides = [1, 1]} : vector<9x128xf32> to vector<7x128xf32>
    %208 = arith.minimumf %205, %206 : vector<7x128xf32>
    %209 = arith.maximumf %205, %206 : vector<7x128xf32>
    %210 = arith.minimumf %209, %207 : vector<7x128xf32>
    %211 = arith.maximumf %208, %210 : vector<7x128xf32>
    %212 = arith.minimumf %199, %211 : vector<7x128xf32>
    %213 = arith.maximumf %199, %211 : vector<7x128xf32>
    %214 = arith.minimumf %213, %204 : vector<7x128xf32>
    %215 = arith.maximumf %212, %214 : vector<7x128xf32>
    %216 = arith.index_cast %c4_i32 : i32 to index
    %c0_57 = arith.constant 0 : index
    %c0_58 = arith.constant 0 : index
    %217 = vector.load %arg3[%216, %c0_57, %c0_58] : memref<7x7x128xf32, #tpu.memory_space<vmem>>, vector<1x7x128xf32>
    %218 = vector.shape_cast %217 : vector<1x7x128xf32> to vector<7x128xf32>
    %219 = vector.shape_cast %215 : vector<7x128xf32> to vector<1x7x128xf32>
    tpu.vector_store %arg3[%216, %c0_57, %c0_58], %219 {strides = array<i32>} : memref<7x7x128xf32, #tpu.memory_space<vmem>>, vector<1x7x128xf32>,
    %c5_i32 = arith.constant 5 : i32
    %c1_i32_59 = arith.constant 1 : i32
    %220 = arith.muli %c5_i32, %c1_i32_59 : i32
    %c0_i32_60 = arith.constant 0 : i32
    %221 = arith.addi %220, %c0_i32_60 : i32
    %222 = arith.index_cast %221 : i32 to index
    %c0_61 = arith.constant 0 : index
    %c0_62 = arith.constant 0 : index
    %223 = vector.load %arg2[%222, %c0_61, %c0_62] : memref<9x9x128xf32, #tpu.memory_space<vmem>>, vector<1x9x128xf32>
    %224 = vector.shape_cast %223 : vector<1x9x128xf32> to vector<9x128xf32>
    %c1_i32_63 = arith.constant 1 : i32
    %225 = arith.addi %220, %c1_i32_63 : i32
    %226 = arith.index_cast %225 : i32 to index
    %c0_64 = arith.constant 0 : index
    %c0_65 = arith.constant 0 : index
    %227 = vector.load %arg2[%226, %c0_64, %c0_65] : memref<9x9x128xf32, #tpu.memory_space<vmem>>, vector<1x9x128xf32>
    %228 = vector.shape_cast %227 : vector<1x9x128xf32> to vector<9x128xf32>
    %c2_i32_66 = arith.constant 2 : i32
    %229 = arith.addi %220, %c2_i32_66 : i32
    %230 = arith.index_cast %229 : i32 to index
    %c0_67 = arith.constant 0 : index
    %c0_68 = arith.constant 0 : index
    %231 = vector.load %arg2[%230, %c0_67, %c0_68] : memref<9x9x128xf32, #tpu.memory_space<vmem>>, vector<1x9x128xf32>
    %232 = vector.shape_cast %231 : vector<1x9x128xf32> to vector<9x128xf32>
    %233 = arith.minimumf %224, %228 : vector<9x128xf32>
    %234 = arith.maximumf %224, %228 : vector<9x128xf32>
    %235 = arith.minimumf %233, %232 : vector<9x128xf32>
    %236 = arith.maximumf %234, %232 : vector<9x128xf32>
    %237 = arith.minimumf %234, %232 : vector<9x128xf32>
    %238 = arith.maximumf %233, %237 : vector<9x128xf32>
    %239 = vector.extract_strided_slice %235 {offsets = [0, 0], sizes = [7, 128], strides = [1, 1]} : vector<9x128xf32> to vector<7x128xf32>
    %240 = vector.extract_strided_slice %235 {offsets = [1, 0], sizes = [7, 128], strides = [1, 1]} : vector<9x128xf32> to vector<7x128xf32>
    %241 = arith.maximumf %239, %240 : vector<7x128xf32>
    %242 = vector.extract_strided_slice %235 {offsets = [2, 0], sizes = [7, 128], strides = [1, 1]} : vector<9x128xf32> to vector<7x128xf32>
    %243 = arith.maximumf %241, %242 : vector<7x128xf32>
    %244 = vector.extract_strided_slice %236 {offsets = [0, 0], sizes = [7, 128], strides = [1, 1]} : vector<9x128xf32> to vector<7x128xf32>
    %245 = vector.extract_strided_slice %236 {offsets = [1, 0], sizes = [7, 128], strides = [1, 1]} : vector<9x128xf32> to vector<7x128xf32>
    %246 = arith.minimumf %244, %245 : vector<7x128xf32>
    %247 = vector.extract_strided_slice %236 {offsets = [2, 0], sizes = [7, 128], strides = [1, 1]} : vector<9x128xf32> to vector<7x128xf32>
    %248 = arith.minimumf %246, %247 : vector<7x128xf32>
    %249 = vector.extract_strided_slice %238 {offsets = [0, 0], sizes = [7, 128], strides = [1, 1]} : vector<9x128xf32> to vector<7x128xf32>
    %250 = vector.extract_strided_slice %238 {offsets = [1, 0], sizes = [7, 128], strides = [1, 1]} : vector<9x128xf32> to vector<7x128xf32>
    %251 = vector.extract_strided_slice %238 {offsets = [2, 0], sizes = [7, 128], strides = [1, 1]} : vector<9x128xf32> to vector<7x128xf32>
    %252 = arith.minimumf %249, %250 : vector<7x128xf32>
    %253 = arith.maximumf %249, %250 : vector<7x128xf32>
    %254 = arith.minimumf %253, %251 : vector<7x128xf32>
    %255 = arith.maximumf %252, %254 : vector<7x128xf32>
    %256 = arith.minimumf %243, %255 : vector<7x128xf32>
    %257 = arith.maximumf %243, %255 : vector<7x128xf32>
    %258 = arith.minimumf %257, %248 : vector<7x128xf32>
    %259 = arith.maximumf %256, %258 : vector<7x128xf32>
    %260 = arith.index_cast %c5_i32 : i32 to index
    %c0_69 = arith.constant 0 : index
    %c0_70 = arith.constant 0 : index
    %261 = vector.load %arg3[%260, %c0_69, %c0_70] : memref<7x7x128xf32, #tpu.memory_space<vmem>>, vector<1x7x128xf32>
    %262 = vector.shape_cast %261 : vector<1x7x128xf32> to vector<7x128xf32>
    %263 = vector.shape_cast %259 : vector<7x128xf32> to vector<1x7x128xf32>
    tpu.vector_store %arg3[%260, %c0_69, %c0_70], %263 {strides = array<i32>} : memref<7x7x128xf32, #tpu.memory_space<vmem>>, vector<1x7x128xf32>,
    %c6_i32 = arith.constant 6 : i32
    %c1_i32_71 = arith.constant 1 : i32
    %264 = arith.muli %c6_i32, %c1_i32_71 : i32
    %c0_i32_72 = arith.constant 0 : i32
    %265 = arith.addi %264, %c0_i32_72 : i32
    %266 = arith.index_cast %265 : i32 to index
    %c0_73 = arith.constant 0 : index
    %c0_74 = arith.constant 0 : index
    %267 = vector.load %arg2[%266, %c0_73, %c0_74] : memref<9x9x128xf32, #tpu.memory_space<vmem>>, vector<1x9x128xf32>
    %268 = vector.shape_cast %267 : vector<1x9x128xf32> to vector<9x128xf32>
    %c1_i32_75 = arith.constant 1 : i32
    %269 = arith.addi %264, %c1_i32_75 : i32
    %270 = arith.index_cast %269 : i32 to index
    %c0_76 = arith.constant 0 : index
    %c0_77 = arith.constant 0 : index
    %271 = vector.load %arg2[%270, %c0_76, %c0_77] : memref<9x9x128xf32, #tpu.memory_space<vmem>>, vector<1x9x128xf32>
    %272 = vector.shape_cast %271 : vector<1x9x128xf32> to vector<9x128xf32>
    %c2_i32_78 = arith.constant 2 : i32
    %273 = arith.addi %264, %c2_i32_78 : i32
    %274 = arith.index_cast %273 : i32 to index
    %c0_79 = arith.constant 0 : index
    %c0_80 = arith.constant 0 : index
    %275 = vector.load %arg2[%274, %c0_79, %c0_80] : memref<9x9x128xf32, #tpu.memory_space<vmem>>, vector<1x9x128xf32>
    %276 = vector.shape_cast %275 : vector<1x9x128xf32> to vector<9x128xf32>
    %277 = arith.minimumf %268, %272 : vector<9x128xf32>
    %278 = arith.maximumf %268, %272 : vector<9x128xf32>
    %279 = arith.minimumf %277, %276 : vector<9x128xf32>
    %280 = arith.maximumf %278, %276 : vector<9x128xf32>
    %281 = arith.minimumf %278, %276 : vector<9x128xf32>
    %282 = arith.maximumf %277, %281 : vector<9x128xf32>
    %283 = vector.extract_strided_slice %279 {offsets = [0, 0], sizes = [7, 128], strides = [1, 1]} : vector<9x128xf32> to vector<7x128xf32>
    %284 = vector.extract_strided_slice %279 {offsets = [1, 0], sizes = [7, 128], strides = [1, 1]} : vector<9x128xf32> to vector<7x128xf32>
    %285 = arith.maximumf %283, %284 : vector<7x128xf32>
    %286 = vector.extract_strided_slice %279 {offsets = [2, 0], sizes = [7, 128], strides = [1, 1]} : vector<9x128xf32> to vector<7x128xf32>
    %287 = arith.maximumf %285, %286 : vector<7x128xf32>
    %288 = vector.extract_strided_slice %280 {offsets = [0, 0], sizes = [7, 128], strides = [1, 1]} : vector<9x128xf32> to vector<7x128xf32>
    %289 = vector.extract_strided_slice %280 {offsets = [1, 0], sizes = [7, 128], strides = [1, 1]} : vector<9x128xf32> to vector<7x128xf32>
    %290 = arith.minimumf %288, %289 : vector<7x128xf32>
    %291 = vector.extract_strided_slice %280 {offsets = [2, 0], sizes = [7, 128], strides = [1, 1]} : vector<9x128xf32> to vector<7x128xf32>
    %292 = arith.minimumf %290, %291 : vector<7x128xf32>
    %293 = vector.extract_strided_slice %282 {offsets = [0, 0], sizes = [7, 128], strides = [1, 1]} : vector<9x128xf32> to vector<7x128xf32>
    %294 = vector.extract_strided_slice %282 {offsets = [1, 0], sizes = [7, 128], strides = [1, 1]} : vector<9x128xf32> to vector<7x128xf32>
    %295 = vector.extract_strided_slice %282 {offsets = [2, 0], sizes = [7, 128], strides = [1, 1]} : vector<9x128xf32> to vector<7x128xf32>
    %296 = arith.minimumf %293, %294 : vector<7x128xf32>
    %297 = arith.maximumf %293, %294 : vector<7x128xf32>
    %298 = arith.minimumf %297, %295 : vector<7x128xf32>
    %299 = arith.maximumf %296, %298 : vector<7x128xf32>
    %300 = arith.minimumf %287, %299 : vector<7x128xf32>
    %301 = arith.maximumf %287, %299 : vector<7x128xf32>
    %302 = arith.minimumf %301, %292 : vector<7x128xf32>
    %303 = arith.maximumf %300, %302 : vector<7x128xf32>
    %304 = arith.index_cast %c6_i32 : i32 to index
    %c0_81 = arith.constant 0 : index
    %c0_82 = arith.constant 0 : index
    %305 = vector.load %arg3[%304, %c0_81, %c0_82] : memref<7x7x128xf32, #tpu.memory_space<vmem>>, vector<1x7x128xf32>
    %306 = vector.shape_cast %305 : vector<1x7x128xf32> to vector<7x128xf32>
    %307 = vector.shape_cast %303 : vector<7x128xf32> to vector<1x7x128xf32>
    tpu.vector_store %arg3[%304, %c0_81, %c0_82], %307 {strides = array<i32>} : memref<7x7x128xf32, #tpu.memory_space<vmem>>, vector<1x7x128xf32>,
    %c7_i32 = arith.constant 7 : i32
    return
  }
  func.func @transform_0(%arg0: i32, %arg1: i32) -> (i32, i32, i32) {
    %c0_i32 = arith.constant 0 : i32
    %c0_i32_0 = arith.constant 0 : i32
    return %arg0, %c0_i32, %arg1 : i32, i32, i32
  }
  func.func @transform_1(%arg0: i32, %arg1: i32) -> (i32, i32, i32) {
    %c0_i32 = arith.constant 0 : i32
    %c0_i32_0 = arith.constant 0 : i32
    return %arg0, %c0_i32, %arg1 : i32, i32, i32
  }
}

</mosaic_0001>

<bundles_post_ra>
// kernel: tpu_custom_call.1
= control target key start
LH: loop header
LB: loop body
LE: loop exit
PB: predicated region body
PF: predicated region fallthrough
CT: control target
= control target key end

     0   :  { %6 = vsyncpa [#allocation3], 0  ;;  %s1060_s0 = inlined_call_operand.vmem [shape: f32[18,9,128], index: 0, kind: input, shape index: {}]   ;;  %s1061_s1 = inlined_call_operand.hbm [shape: f32[14,7,128], index: 1, kind: output, shape index: {}]  }
   0x1   :  { %8 = vsyncpa [#allocation3 + $0x1], 0  ;;  %s849_s6 = smov 0   ;;  %s851_s7 = smov 0  }
   0x2   :  { %s853_s8 = smov 0   ;;  %s855_s9 = smov 0  }
   0x3   :  { %s857_s10 = smov 0   ;;  %s859_s11 = smov 0  }
   0x4 LB: > { %s641_s12 = sadd.s32 4294967295, %s835_s11   ;;  %s642_s13 = sadd.s32 4294967294, %s835_s11   ;;  %s835_s11 = sphi %s859_s11, %s14_s11   ;;  %s831_s10 = sphi %s857_s10, %s1068_s10   ;;  %s827_s9 = sphi %s855_s9, %s1067_s9   ;;  %s823_s8 = sphi %s853_s8, %s1066_s8   ;;  %s819_s7 = sphi %s851_s7, %s1065_s7   ;;  %s815_s6 = sphi %s849_s6, %s1064_s6  }
   0x5   : > { %s26_s14 = sadd.s32 1, %s831_s10  ;;  %s63_s15 = sadd.s32 1, %s823_s8 }
   0x6   : > { %p28_p0 = scmp.ge.s32.totalorder %s26_s14, 2  ;;  %p73_p1 = scmp.ne.s32.totalorder %s823_s8, %s819_s7 }
   0x7   : > { %p74_p2 = scmp.eq.s32.totalorder %s641_s12, 1  ;;  %p79_p3 = scmp.ne.s32.totalorder %s819_s7, %s815_s6 }
   0x8   : > { %s1070_s14 = smov (%p28_p0, %s26_s14), 0  ;;  %p80_p5 = scmp.eq.s32.totalorder %s642_s13, 1 }
   0x9   : > { %p889_p4 = por %p74_p2, %p73_p1  ;;  %s58_s17 = ssub.s32 %s831_s10, %s1070_s14 }
   0xa   : > { %p645_p6 = scmp.ge.s32.totalorder %s835_s11, 1  ;;  %p61_p7 = scmp.eq.s32.totalorder %s58_s17, 0 }
   0xb   : > { %p896_p8 = por %p80_p5, %p79_p3  ;;  %p111_p9 = scmp.lt.s32.totalorder %s835_s11, 3 }
   0xc   : > { %s902_s19 = scalar_select %p61_p7, %s823_s8, %s63_s15  }
   0xd   : > { %p112_p10 = pnand %p645_p6, %p111_p9 }
   0xe   : > { %s135_s20 = smul.u32 (!%p112_p10), 9, %s827_s9  ;;  %s132_s25 = sand.u32 (!%p112_p10), 1, %s819_s7  }
   0xf   : > { %115 = sbr.rel (%p112_p10) target bundleno = 101 (0x65), region = 24  ;;  %s547_s5 = scalar_lea.sflag (!%p112_p10), [#allocation3], %s132_s25 }
  0x10   : > { %p136_p11 = scmp.lt.s32.totalorder (!%p112_p10), %s135_s20, 17  ;;  %s938_s26 = smul.u32 (!%p112_p10), 56, %s132_s25 }
  0x11   : > { %s698_s28 = smul.u32 (!%p112_p10), 56, %s827_s9  ;;  %s777_s17 = scalar_lea.hbm (!%p112_p10), %s1061_s1, 112 }
  0x12   : > { %s957_s27 = scalar_lea.vmem (!%p112_p10), [#allocation2], %s938_s26 }
  0x13   : > { %s559_s2 = scalar_lea.hbm (!%p112_p10), %s1061_s1, %s698_s28  ;;  %s560_s3 = sshll.u32 (!%p112_p10), %s957_s27, 4  ;;  %s561_s3 = int_to_ptr.vmem [resolvable:$true] %s560_s3 }
  0x14   : > { %s1072_s20 = smov (!%p136_p11, %s135_s20), 17  ;;  %vm171_vm0 = vcmask 1045504   ;;  %s562_s4 = sshll.u32 %s559_s2, 4  ;;  %s563_s4 = int_to_ptr.hbm [resolvable:$true] %s562_s4 }
  0x15   : > { %s697_s21 = sshll.u32 %s1072_s20, 4  ;;  %s771_s9 = sshra.s32 %s563_s4, 4  ;;  %s772_s9 = int_to_ptr.hbm [resolvable:$true] %s771_s9 }
  0x16   : > { %s908_s24 = scalar_lea.vmem %s1060_s0, %s697_s21  ;;  %s773_s12 = scalar_lea.hbm %s772_s9, 56 }
  0x17   : > { %v146_v0 = vld [vmem:[%s908_s24] sm:$0xff]  ;;  %v147_v1 = vld [vmem:[%s908_s24 + $0x8] sm:$0x1]  ;;  %v648_v2 = vld [vmem:[%s908_s24 + $0x10] sm:$0xff]  ;;  %p774_p12 = scmp.ne.s32.totalorder %s772_s9, %s773_s12  ;;  %p778_p1 = scmp.lt.s32.totalorder %s772_s9, %s1061_s1 }
  0x18   : > { %v649_v3 = vld [vmem:[%s908_s24 + $0x18] sm:$0x1]  ;;  %v915_v4 = vld [vmem:[%s908_s24 + $0x20] sm:$0xff]  ;;  %v651_v5 = vld [vmem:[%s908_s24 + $0x28] sm:$0x1]  ;;  %v154_v6 = vmin.f32 %v146_v0, %v648_v2  ;;  %v156_v7 = vmax.f32 %v146_v0, %v648_v2  ;;  %p779_p2 = scmp.lt.s32.totalorder %s777_s17, %s773_s12 }
  0x19   : > { %v155_v8 = vmin.f32 %v147_v1, %v649_v3  ;;  %v157_v9 = vmax.f32 %v147_v1, %v649_v3  ;;  %v653_v10 = vld [vmem:[%s908_s24 + $0x18] sm:$0x1]  ;;  %v655_v11 = vld [vmem:[%s908_s24 + $0x28] sm:$0x1]  ;;  %v211_v12 = vmin.f32 %v648_v2, %v915_v4  ;;  %v213_v13 = vmax.f32 %v648_v2, %v915_v4  ;;  %v926_v34 = vld [vmem:[%s908_s24 + $0x30] sm:$0xff]  ;;  %p775_p13 = pnand %p774_p12, %p889_p4 }
  0x1a   : > { %v158_v14 = vmin.f32 %v154_v6, %v915_v4  ;;  %v160_v15 = vmax.f32 %v156_v7, %v915_v4  ;;  %v162_v16 = vmin.f32 %v156_v7, %v915_v4  ;;  %v212_v17 = vmin.f32 %v653_v10, %v655_v11  ;;  %v657_v38 = vld [vmem:[%s908_s24 + $0x38] sm:$0x1]  ;;  %v660_v2 = vld [vmem:[%s908_s24 + $0x28] sm:$0x1]  ;;  %p780_p3 = por %p779_p2, %p778_p1 }
  0x1b   : > { %v159_v18 = vmin.f32 %v155_v8, %v651_v5  ;;  %v161_v19 = vmax.f32 %v157_v9, %v651_v5  ;;  %v163_v20 = vmin.f32 %v157_v9, %v651_v5  ;;  %v214_v21 = vmax.f32 %v653_v10, %v655_v11  ;;  %v662_v3 = vld [vmem:[%s908_s24 + $0x38] sm:$0x1]  ;;  %p776_p0 = pneg %p775_p13 }
  0x1c   : > { %v164_v22 = vmax.f32 %v154_v6, %v162_v16  ;;  %v167_v23 = vrot.slane %v158_v14, 1  ;;  %v172_v24 = vrot.slane %v158_v14, 2  ;;  %v178_v25 = vrot.slane %v160_v15, 1 }
  0x1d   : > { %v165_v26 = vmax.f32 %v155_v8, %v163_v20  ;;  %v173_v27 = vrot.slane %v159_v18, 2  ;;  %v182_v28 = vrot.slane %v160_v15, 2  ;;  %v183_v29 = vrot.slane %v161_v19, 2  ;;  %p781_p5 = pnand %p780_p3, %p776_p0 }
  0x1e   : > { %v169_v30 = vmax.f32 %v158_v14, %v167_v23  ;;  %v180_v31 = vmin.f32 %v160_v15, %v178_v25  ;;  %v188_v32 = vrot.slane %v164_v22, 1  ;;  %v193_v33 = vrot.slane %v164_v22, 2  ;;  %v664_v14 = vld [vmem:[%s908_s24 + $0x48] sm:$0x1] }
  0x1f   : > { %v174_v35 = vsel %vm171_vm0, %v172_v24, %v173_v27  ;;  %v184_v36 = vsel %vm171_vm0, %v182_v28, %v183_v29  ;;  %v194_v37 = vrot.slane %v165_v26, 2  ;;  %v215_v39 = vmin.f32 %v211_v12, %v926_v34 }
  0x20   : > { %v176_v40 = vmax.f32 %v169_v30, %v174_v35  ;;  %v186_v41 = vmin.f32 %v180_v31, %v184_v36  ;;  %v190_v42 = vmin.f32 %v164_v22, %v188_v32  ;;  %v191_v43 = vmax.f32 %v164_v22, %v188_v32 }
  0x21   : > { %v195_v44 = vsel %vm171_vm0, %v193_v33, %v194_v37  ;;  %v216_v45 = vmin.f32 %v212_v17, %v657_v38  ;;  %v217_v46 = vmax.f32 %v213_v13, %v926_v34  ;;  %v218_v47 = vmax.f32 %v214_v21, %v657_v38 }
  0x22   : > { %v197_v48 = vmin.f32 %v191_v43, %v195_v44  ;;  %v219_v49 = vmin.f32 %v213_v13, %v926_v34  ;;  %v220_v50 = vmin.f32 %v214_v21, %v657_v38  ;;  %v224_v51 = vrot.slane %v215_v39, 1  ;;  %v947_v13 = vld [vmem:[%s908_s24 + $0x40] sm:$0xff] }
  0x23   : > { %v228_v52 = vrot.slane %v215_v39, 2  ;;  %v229_v53 = vrot.slane %v216_v45, 2  ;;  %v234_v54 = vrot.slane %v217_v46, 1  ;;  %v238_v55 = vrot.slane %v217_v46, 2  ;;  %v669_v45 = vld [vmem:[%s908_s24 + $0x48] sm:$0x1] }
  0x24   : > { %v198_v56 = vmax.f32 %v190_v42, %v197_v48  ;;  %v221_v57 = vmax.f32 %v211_v12, %v219_v49  ;;  %v222_v58 = vmax.f32 %v212_v17, %v220_v50  ;;  %v226_v59 = vmax.f32 %v215_v39, %v224_v51  ;;  %v667_v39 = vld [vmem:[%s908_s24 + $0x38] sm:$0x1] }
  0x25   : > { %v230_v60 = vsel %vm171_vm0, %v228_v52, %v229_v53  ;;  %v236_v61 = vmin.f32 %v217_v46, %v234_v54  ;;  %v239_v62 = vrot.slane %v218_v47, 2  ;;  %v268_v5 = vmin.f32 %v915_v4, %v926_v34  ;;  %v671_v53 = vld [vmem:[%s908_s24 + $0x58] sm:$0x1] }
  0x26   : > { %v199_v63 = vmin.f32 %v176_v40, %v198_v56  ;;  %v200_v0 = vmax.f32 %v176_v40, %v198_v56  ;;  %v244_v1 = vrot.slane %v221_v57, 1  ;;  %v232_v6 = vmax.f32 %v226_v59, %v230_v60 }
  0x27   : > { %v240_v7 = vsel %vm171_vm0, %v238_v55, %v239_v62  ;;  %v249_v8 = vrot.slane %v221_v57, 2  ;;  %v250_v9 = vrot.slane %v222_v58, 2  ;;  %v269_v15 = vmin.f32 %v660_v2, %v662_v3  ;;  %v971_v58 = vld [vmem:[%s908_s24 + $0x50] sm:$0xff] }
  0x28   : > { %v201_v10 = vmin.f32 %v200_v0, %v186_v41  ;;  %v246_v11 = vmin.f32 %v221_v57, %v244_v1  ;;  %v247_v12 = vmax.f32 %v221_v57, %v244_v1  ;;  %v270_v17 = vmax.f32 %v915_v4, %v926_v34 }
  0x29   : > { %v251_v16 = vsel %vm171_vm0, %v249_v8, %v250_v9  ;;  %v271_v18 = vmax.f32 %v660_v2, %v662_v3  ;;  %v272_v19 = vmin.f32 %v268_v5, %v947_v13  ;;  %v242_v21 = vmin.f32 %v236_v61, %v240_v7 }
  0x2a   : > { %v202_v20 = vmax.f32 %v199_v63, %v201_v10  ;;  %v253_v22 = vmin.f32 %v247_v12, %v251_v16  ;;  %v273_v23 = vmin.f32 %v269_v15, %v664_v14  ;;  %v274_v24 = vmax.f32 %v270_v17, %v947_v13  ;;  %v674_v16 = vld [vmem:[%s908_s24 + $0x48] sm:$0x1] }
  0x2b   : > { %v275_v25 = vmax.f32 %v271_v18, %v664_v14  ;;  %v276_v26 = vmin.f32 %v270_v17, %v947_v13  ;;  %v277_v27 = vmin.f32 %v271_v18, %v664_v14  ;;  %v281_v4 = vrot.slane %v272_v19, 1 }
  0x2c   : > { %203 = vst [vmem:[%s957_s27] sm:$0x7f] %v202_v20  ;;  %v254_v28 = vmax.f32 %v246_v11, %v253_v22  ;;  %v285_v29 = vrot.slane %v272_v19, 2  ;;  %v286_v30 = vrot.slane %v273_v23, 2  ;;  %v291_v33 = vrot.slane %v274_v24, 1  ;;  %v676_v22 = vld [vmem:[%s908_s24 + $0x58] sm:$0x1] }
  0x2d   : > { %v278_v31 = vmax.f32 %v268_v5, %v276_v26  ;;  %v279_v32 = vmax.f32 %v269_v15, %v277_v27  ;;  %v295_v35 = vrot.slane %v274_v24, 2  ;;  %v283_v38 = vmax.f32 %v272_v19, %v281_v4 }
  0x2e   : > { %v255_v36 = vmin.f32 %v232_v6, %v254_v28  ;;  %v256_v37 = vmax.f32 %v232_v6, %v254_v28  ;;  %v325_v40 = vmin.f32 %v926_v34, %v947_v13  ;;  %v287_v41 = vsel %vm171_vm0, %v285_v29, %v286_v30  ;;  %v678_v29 = vld [vmem:[%s908_s24 + $0x68] sm:$0x1] }
  0x2f   : > { %v296_v42 = vrot.slane %v275_v25, 2  ;;  %v301_v43 = vrot.slane %v278_v31, 1  ;;  %v306_v44 = vrot.slane %v278_v31, 2  ;;  %v293_v47 = vmin.f32 %v274_v24, %v291_v33 }
  0x30   : > { %v257_v46 = vmin.f32 %v256_v37, %v242_v21  ;;  %v307_v48 = vrot.slane %v279_v32, 2  ;;  %v326_v49 = vmin.f32 %v667_v39, %v669_v45  ;;  %v327_v54 = vmax.f32 %v926_v34, %v947_v13 }
  0x31   : > { %v297_v50 = vsel %vm171_vm0, %v295_v35, %v296_v42  ;;  %v303_v51 = vmin.f32 %v278_v31, %v301_v43  ;;  %v304_v52 = vmax.f32 %v278_v31, %v301_v43  ;;  %v289_v56 = vmax.f32 %v283_v38, %v287_v41  ;;  %v988_v35 = vld [vmem:[%s908_s24 + $0x60] sm:$0xff] }
  0x32   : > { %v258_v55 = vmax.f32 %v255_v36, %v257_v46  ;;  %v308_v57 = vsel %vm171_vm0, %v306_v44, %v307_v48  ;;  %v328_v59 = vmax.f32 %v667_v39, %v669_v45  ;;  %v329_v61 = vmin.f32 %v325_v40, %v971_v58 }
  0x33   : > { %v310_v60 = vmin.f32 %v304_v52, %v308_v57  ;;  %v330_v62 = vmin.f32 %v326_v49, %v671_v53  ;;  %v331_v63 = vmax.f32 %v327_v54, %v971_v58  ;;  %v299_v0 = vmin.f32 %v293_v47, %v297_v50 }
  0x34   : > { %658 = vst [vmem:[%s957_s27 + $0x8] sm:$0x7f] %v258_v55  ;;  %v332_v1 = vmax.f32 %v328_v59, %v671_v53  ;;  %v333_v2 = vmin.f32 %v327_v54, %v971_v58  ;;  %v334_v34 = vmin.f32 %v328_v59, %v671_v53  ;;  %v338_v5 = vrot.slane %v329_v61, 1  ;;  %v681_v55 = vld [vmem:[%s908_s24 + $0x58] sm:$0x1] }
  0x35   : > { %v311_v3 = vmax.f32 %v303_v51, %v310_v60  ;;  %v342_v6 = vrot.slane %v329_v61, 2  ;;  %v343_v7 = vrot.slane %v330_v62, 2  ;;  %v348_v10 = vrot.slane %v331_v63, 1  ;;  %v683_v62 = vld [vmem:[%s908_s24 + $0x68] sm:$0x1] }
  0x36   : > { %v335_v8 = vmax.f32 %v325_v40, %v333_v2  ;;  %v336_v9 = vmax.f32 %v326_v49, %v334_v34  ;;  %v352_v11 = vrot.slane %v331_v63, 2  ;;  %v340_v15 = vmax.f32 %v329_v61, %v338_v5 }
  0x37   : > { %v312_v12 = vmin.f32 %v289_v56, %v311_v3  ;;  %v313_v14 = vmax.f32 %v289_v56, %v311_v3  ;;  %v382_v17 = vmin.f32 %v947_v13, %v971_v58  ;;  %v344_v18 = vsel %vm171_vm0, %v342_v6, %v343_v7  ;;  %v685_v6 = vld [vmem:[%s908_s24 + $0x78] sm:$0x1] }
  0x38   : > { %v353_v19 = vrot.slane %v332_v1, 2  ;;  %v358_v20 = vrot.slane %v335_v8, 1  ;;  %v363_v21 = vrot.slane %v335_v8, 2  ;;  %v350_v24 = vmin.f32 %v331_v63, %v348_v10 }
  0x39   : > { %v314_v23 = vmin.f32 %v313_v14, %v299_v0  ;;  %v364_v25 = vrot.slane %v336_v9, 2  ;;  %v383_v26 = vmin.f32 %v674_v16, %v676_v22  ;;  %v384_v30 = vmax.f32 %v947_v13, %v971_v58 }
  0x3a   : > { %v354_v27 = vsel %vm171_vm0, %v352_v11, %v353_v19  ;;  %v360_v28 = vmin.f32 %v335_v8, %v358_v20  ;;  %v361_v4 = vmax.f32 %v335_v8, %v358_v20  ;;  %v346_v32 = vmax.f32 %v340_v15, %v344_v18  ;;  %v684_v11 = vld [vmem:[%s908_s24 + $0x70] sm:$0xff] }
  0x3b   : > { %v315_v31 = vmax.f32 %v312_v12, %v314_v23  ;;  %v365_v33 = vsel %vm171_vm0, %v363_v21, %v364_v25  ;;  %v385_v36 = vmax.f32 %v674_v16, %v676_v22  ;;  %v386_v38 = vmin.f32 %v382_v17, %v988_v35 }
  0x3c   : > { %v367_v37 = vmin.f32 %v361_v4, %v365_v33  ;;  %v387_v39 = vmin.f32 %v383_v26, %v678_v29  ;;  %v388_v40 = vmax.f32 %v384_v30, %v988_v35  ;;  %v356_v41 = vmin.f32 %v350_v24, %v354_v27 }
  0x3d   : > { %665 = vst [vmem:[%s957_s27 + $0x10] sm:$0x7f] %v315_v31  ;;  %v389_v42 = vmax.f32 %v385_v36, %v678_v29  ;;  %v390_v43 = vmin.f32 %v384_v30, %v988_v35  ;;  %v391_v13 = vmin.f32 %v385_v36, %v678_v29  ;;  %v395_v45 = vrot.slane %v386_v38, 1  ;;  %v688_v31 = vld [vmem:[%s908_s24 + $0x68] sm:$0x1] }
  0x3e   : > { %v368_v44 = vmax.f32 %v360_v28, %v367_v37  ;;  %v399_v46 = vrot.slane %v386_v38, 2  ;;  %v400_v47 = vrot.slane %v387_v39, 2  ;;  %v405_v50 = vrot.slane %v388_v40, 1  ;;  %v690_v39 = vld [vmem:[%s908_s24 + $0x78] sm:$0x1] }
  0x3f   : > { %v392_v48 = vmax.f32 %v382_v17, %v390_v43  ;;  %v393_v49 = vmax.f32 %v383_v26, %v391_v13  ;;  %v409_v51 = vrot.slane %v388_v40, 2  ;;  %v397_v54 = vmax.f32 %v386_v38, %v395_v45 }
  0x40   : > { %v369_v52 = vmin.f32 %v346_v32, %v368_v44  ;;  %v370_v53 = vmax.f32 %v346_v32, %v368_v44  ;;  %v439_v56 = vmin.f32 %v971_v58, %v988_v35  ;;  %v401_v57 = vsel %vm171_vm0, %v399_v46, %v400_v47  ;;  %v691_v46 = vld [vmem:[%s908_s24 + $0x80] sm:$0xff]  ;;  %v692_v47 = vld [vmem:[%s908_s24 + $0x88] sm:$0x1] }
  0x41   : > { %v410_v59 = vrot.slane %v389_v42, 2  ;;  %v415_v60 = vrot.slane %v392_v48, 1  ;;  %v420_v61 = vrot.slane %v392_v48, 2  ;;  %v407_v0 = vmin.f32 %v388_v40, %v405_v50 }
  0x42   : > { %v371_v63 = vmin.f32 %v370_v53, %v356_v41  ;;  %v421_v1 = vrot.slane %v393_v49, 2  ;;  %v440_v2 = vmin.f32 %v681_v55, %v683_v62  ;;  %v441_v7 = vmax.f32 %v971_v58, %v988_v35 }
  0x43   : > { %v411_v34 = vsel %vm171_vm0, %v409_v51, %v410_v59  ;;  %v417_v3 = vmin.f32 %v392_v48, %v415_v60  ;;  %v418_v5 = vmax.f32 %v392_v48, %v415_v60  ;;  %v403_v9 = vmax.f32 %v397_v54, %v401_v57 }
  0x44   : > { %v372_v8 = vmax.f32 %v369_v52, %v371_v63  ;;  %v422_v10 = vsel %vm171_vm0, %v420_v61, %v421_v1  ;;  %v442_v12 = vmax.f32 %v681_v55, %v683_v62  ;;  %v443_v15 = vmin.f32 %v439_v56, %v684_v11 }
  0x45   : > { %v424_v14 = vmin.f32 %v418_v5, %v422_v10  ;;  %v444_v16 = vmin.f32 %v440_v2, %v685_v6  ;;  %v445_v17 = vmax.f32 %v441_v7, %v684_v11  ;;  %v413_v18 = vmin.f32 %v407_v0, %v411_v34 }
  0x46   : > { %672 = vst [vmem:[%s957_s27 + $0x18] sm:$0x7f] %v372_v8  ;;  %v446_v19 = vmax.f32 %v442_v12, %v685_v6  ;;  %v447_v20 = vmin.f32 %v441_v7, %v684_v11  ;;  %v448_v21 = vmin.f32 %v442_v12, %v685_v6  ;;  %v452_v23 = vrot.slane %v443_v15, 1 }
  0x47   : > { %v425_v22 = vmax.f32 %v417_v3, %v424_v14  ;;  %v456_v58 = vrot.slane %v443_v15, 2  ;;  %v457_v24 = vrot.slane %v444_v16, 2  ;;  %v462_v27 = vrot.slane %v445_v17, 1 }
  0x48   : > { %v449_v25 = vmax.f32 %v439_v56, %v447_v20  ;;  %v450_v26 = vmax.f32 %v440_v2, %v448_v21  ;;  %v466_v28 = vrot.slane %v445_v17, 2  ;;  %v454_v30 = vmax.f32 %v443_v15, %v452_v23 }
  0x49   : > { %v426_v4 = vmin.f32 %v403_v9, %v425_v22  ;;  %v427_v29 = vmax.f32 %v403_v9, %v425_v22  ;;  %v496_v32 = vmin.f32 %v988_v35, %v684_v11  ;;  %v458_v33 = vsel %vm171_vm0, %v456_v58, %v457_v24 }
  0x4a   : > { %v467_v36 = vrot.slane %v446_v19, 2  ;;  %v472_v37 = vrot.slane %v449_v25, 1  ;;  %v477_v38 = vrot.slane %v449_v25, 2  ;;  %v464_v41 = vmin.f32 %v445_v17, %v462_v27 }
  0x4b   : > { %v428_v40 = vmin.f32 %v427_v29, %v413_v18  ;;  %v478_v42 = vrot.slane %v450_v26, 2  ;;  %v497_v43 = vmin.f32 %v688_v31, %v690_v39  ;;  %v498_v48 = vmax.f32 %v988_v35, %v684_v11 }
  0x4c   : > { %v468_v13 = vsel %vm171_vm0, %v466_v28, %v467_v36  ;;  %v474_v44 = vmin.f32 %v449_v25, %v472_v37  ;;  %v475_v45 = vmax.f32 %v449_v25, %v472_v37  ;;  %v460_v50 = vmax.f32 %v454_v30, %v458_v33 }
  0x4d   : > { %v429_v49 = vmax.f32 %v426_v4, %v428_v40  ;;  %v479_v51 = vsel %vm171_vm0, %v477_v38, %v478_v42  ;;  %v499_v52 = vmax.f32 %v688_v31, %v690_v39  ;;  %v500_v54 = vmin.f32 %v496_v32, %v691_v46 }
  0x4e   : > { %v481_v53 = vmin.f32 %v475_v45, %v479_v51  ;;  %v501_v55 = vmin.f32 %v497_v43, %v692_v47  ;;  %v502_v56 = vmax.f32 %v498_v48, %v691_v46  ;;  %v470_v57 = vmin.f32 %v464_v41, %v468_v13 }
  0x4f   : > { %679 = vst [vmem:[%s957_s27 + $0x20] sm:$0x7f] %v429_v49  ;;  %v503_v59 = vmax.f32 %v499_v52, %v692_v47  ;;  %v504_v60 = vmin.f32 %v498_v48, %v691_v46  ;;  %v505_v61 = vmin.f32 %v499_v52, %v692_v47  ;;  %v509_v63 = vrot.slane %v500_v54, 1 }
  0x50   : > { %v482_v62 = vmax.f32 %v474_v44, %v481_v53  ;;  %v513_v0 = vrot.slane %v500_v54, 2  ;;  %v514_v1 = vrot.slane %v501_v55, 2  ;;  %v519_v34 = vrot.slane %v502_v56, 1 }
  0x51   : > { %v506_v2 = vmax.f32 %v496_v32, %v504_v60  ;;  %v507_v35 = vmax.f32 %v497_v43, %v505_v61  ;;  %v523_v6 = vrot.slane %v502_v56, 2  ;;  %v511_v7 = vmax.f32 %v500_v54, %v509_v63 }
  0x52   : > { %v483_v3 = vmin.f32 %v460_v50, %v482_v62  ;;  %v484_v5 = vmax.f32 %v460_v50, %v482_v62  ;;  %v524_v8 = vrot.slane %v503_v59, 2  ;;  %v515_v12 = vsel %vm171_vm0, %v513_v0, %v514_v1 }
  0x53   : > { %v529_v9 = vrot.slane %v506_v2, 1  ;;  %v534_v10 = vrot.slane %v506_v2, 2  ;;  %v535_v14 = vrot.slane %v507_v35, 2  ;;  %v521_v15 = vmin.f32 %v502_v56, %v519_v34 }
  0x54   : > { %v485_v11 = vmin.f32 %v484_v5, %v470_v57  ;;  %v525_v19 = vsel %vm171_vm0, %v523_v6, %v524_v8  ;;  %v517_v21 = vmax.f32 %v511_v7, %v515_v12 }
  0x55   : > { %v531_v16 = vmin.f32 %v506_v2, %v529_v9  ;;  %v532_v17 = vmax.f32 %v506_v2, %v529_v9  ;;  %v536_v20 = vsel %vm171_vm0, %v534_v10, %v535_v14  ;;  %v527_v23 = vmin.f32 %v521_v15, %v525_v19 }
  0x56   : > { %v486_v18 = vmax.f32 %v483_v3, %v485_v11 }
  0x57   : > { %v538_v22 = vmin.f32 %v532_v17, %v536_v20 }
  0x58   : > { %686 = vst [vmem:[%s957_s27 + $0x28] sm:$0x7f] %v486_v18 }
  0x59   : > { %v539_v58 = vmax.f32 %v531_v16, %v538_v22 }
  0x5b   : > { %v540_v24 = vmin.f32 %v517_v21, %v539_v58  ;;  %v541_v25 = vmax.f32 %v517_v21, %v539_v58 }
  0x5d   : > { %v542_v26 = vmin.f32 %v541_v25, %v527_v23 }
  0x5f   : > { %v543_v27 = vmax.f32 %v540_v24, %v542_v26 }
  0x61   : > { %693 = vst [vmem:[%s957_s27 + $0x30] sm:$0x7f] %v543_v27 }
  0x62   : > { %784 = shalt.err (!%p781_p5)
}
  0x63   : > { %s837_s22 = smov 128   ;;  %s838_s23 = smov 8  }
  0x64   : > { %700 = dma.vmem_to_hbm [thread:$0]  (%p889_p4), %s561_s3, 896, %s563_s4, %s547_s5, %s837_s22, %s837_s22, %s838_s23  }
  0x65 PF: > { %p706_p6 = scmp.ge.s32.totalorder %s835_s11, 2  ;;  %s577_s24 = sand.u32 1, %s815_s6  }
  0x66   : > { %s578_s25 = scalar_lea.sflag [#allocation3], %s577_s24 }
  0x67   : > { %p703_p7 = pnand %p706_p6, %p896_p8 }
  0x69   : > { %p704_p9 = pneg %p703_p7 }
  0x6b   : > { %810 = dma.done.wait (%p704_p9), %s578_s25, 896  }
  0x6c   : > { %812 = vsyncadd (%p704_p9), %s578_s25, 4294966400  ;;  %s14_s11 = sadd.s32 1, %s835_s11   ;;  %s1064_s6 = smov %s819_s7 }
  0x6d   : > { %p11_p10 = scmp.ge.s32.totalorder %s14_s11, 4   ;;  %s1065_s7 = smov %s823_s8 }
  0x6e   : > { %s1066_s8 = smov %s902_s19  ;;  %s1067_s9 = smov %s831_s10 }
  0x6f   : > { %s1068_s10 = smov %s1070_s14  ;;  %13 = sbr.rel (!%p11_p10) target bundleno = 4 (0x4), region = 73 }
  0x74   :  { %584 = vsyncpa [#allocation3], 1 }
  0x75   :  { %586 = vsyncpa [#allocation3 + $0x1], 1 }

</bundles_post_ra>
